<compile_context>
chip_gen: v6e
topology: v6e:2x2x1
jax: 0.10.0
libtpu: 0.0.40
codegen_flags: <defaults>
</compile_context>

<pallas_src>
import jax
import jax.numpy as jnp
from jax import lax
import numpy as np
from jax.experimental import pallas as pl
from jax.experimental.pallas import tpu as pltpu

HIDDEN_SIZE = 10
INPUT_SIZE = 1
NUM_LAYERS = 1   # module hard-codes a single-layer recurrence in this kernel
OUTPUT_SIZE = 1

LANE = 128          # TPU lane width
SUBLANE = 8         # f32 sublane count
GATE_STRIDE = 32    # per-gate lane stride inside the single 128-lane gate block


def _round_up(x, m):
    return (x + m - 1) // m * m


def _lstm_fc_kernel(x_ref, wih_ref, whh_ref, b_ref, wfc_ref, bfc_ref, out_ref):
    """Whole forward pass in one kernel: LSTM recurrence over T, then ReLU + Linear.

    x_ref   : (T, BP, I)   time-major input, batch padded to a sublane multiple
    wih_ref : (I,  128)    fused input->hidden weights; gate k at lanes [k*32, k*32+H)
    whh_ref : (HP, 128)    fused hidden->hidden weights (rows >= H are zero)
    b_ref   : (1,  128)    combined bias (b_ih + b_hh), same fused lane layout
    wfc_ref : (HP, OP)     final Linear weight (transposed, zero padded)
    bfc_ref : (1,  OP)     final Linear bias (zero padded)
    out_ref : (BP, OP)     lane-dense output (unmasked vst)
    """
    T, BP, I = x_ref.shape
    HP, G = whh_ref.shape           # HP = hidden rounded up to sublane multiple, G = 128
    S = G // 4                      # per-gate lane stride (32)

    # ---- Hoist every weight / bias load out of the recurrence (a few KiB total).
    w_ih = wih_ref[...]             # (I, G)
    w_hh = whh_ref[...]             # (HP, G)
    bias = b_ref[...]               # (1, G)
    w_fc = wfc_ref[...]             # (HP, OP)
    b_fc = bfc_ref[...]             # (1, OP)

    def sigmoid(v):
        # sigmoid(x) == 0.5*tanh(0.5*x) + 0.5 : one EUP op + cheap VPU mul/add
        return 0.5 * jnp.tanh(0.5 * v) + 0.5

    h = jnp.zeros((BP, HP), jnp.float32)
    c = jnp.zeros((BP, HP), jnp.float32)

    # ---- Serial LSTM recurrence, fully unrolled (T is small & static).  A static Python
    # loop == full unroll with compile-time indices, giving the LLO scheduler cross-step
    # visibility (MXU push of step t+1 can overlap EUP/VPU work of step t).
    # TODO(synk): pin w_hh in the MXU across the unrolled steps via
    # pltpu.matmul_push_rhs / matmul_acc_lhs / matmul_pop once a bundle dump confirms the
    # repeated identical-RHS weight load is on the per-step critical path.
    for t in range(T):
        x_t = x_ref[t]                                           # (BP, I)
        if I == 1:
            # input_size == 1 -> pure VPU broadcast multiply, no MXU, not on serial chain
            pre_t = x_t * w_ih + bias                            # (BP, G)
        else:  # general fallback (dead at these shapes)
            pre_t = jnp.dot(x_t, w_ih, preferred_element_type=jnp.float32) + bias

        # Single (BP,HP)x(HP,128) MXU tile produces all four gates.
        z = pre_t + jnp.dot(h, w_hh, preferred_element_type=jnp.float32)     # (BP, G)

        # Static intra-tile lane slices: gate k at lanes [k*S, k*S + HP).
        i_g = sigmoid(z[:, 0 * S:0 * S + HP])
        f_g = sigmoid(z[:, 1 * S:1 * S + HP])
        g_g = jnp.tanh(z[:, 2 * S:2 * S + HP])
        o_g = sigmoid(z[:, 3 * S:3 * S + HP])
        c = f_g * c + i_g * g_g
        h = o_g * jnp.tanh(c)

    # fc = Sequential(ReLU(), Linear(H, O)) applied to the last hidden state.
    relu_h = jnp.maximum(h, 0.0)
    out_ref[...] = jnp.dot(relu_h, w_fc, preferred_element_type=jnp.float32) + b_fc


def pack_params(params):
    """One-time repacking of PyTorch-layout LSTM/Linear weights into the fused TPU layout.

    Kept out of the per-call forward path: for a kernel whose on-chip time is a few us,
    per-call scatter/pad/transpose ops would dominate wall clock.
    """
    H, I, O = HIDDEN_SIZE, INPUT_SIZE, OUTPUT_SIZE
    HP = _round_up(H, SUBLANE)
    OP = _round_up(O, LANE)
    G = LANE
    S = GATE_STRIDE
    assert HP <= S and 4 * S <= G, "gate packing requires HP <= stride and 4*stride <= 128"

    w_ih, w_hh = params["w_ih"], params["w_hh"]       # (4H, I), (4H, H)
    b = (params["b_ih"] + params["b_hh"]).astype(jnp.float32)    # (4H,)
    w_fc, b_fc = params["w_fc"], params["b_fc"]       # (O, H), (O,)

    wih_g = jnp.transpose(w_ih.reshape(4, H, I), (0, 2, 1)).astype(jnp.float32)  # (4, I, H)
    whh_g = jnp.transpose(w_hh.reshape(4, H, H), (0, 2, 1)).astype(jnp.float32)  # (4, Hin, Hout)

    wih_p = jnp.zeros((I, G), jnp.float32)
    whh_p = jnp.zeros((HP, G), jnp.float32)
    b_p = jnp.zeros((1, G), jnp.float32)
    for k in range(4):
        lo = k * S
        wih_p = wih_p.at[:, lo:lo + H].set(wih_g[k])
        whh_p = whh_p.at[:H, lo:lo + H].set(whh_g[k])
        b_p = b_p.at[0, lo:lo + H].set(b[k * H:(k + 1) * H])

    wfc_p = jnp.zeros((HP, OP), jnp.float32).at[:H, :O].set(w_fc.T.astype(jnp.float32))
    bfc_p = jnp.zeros((1, OP), jnp.float32).at[0, :O].set(b_fc.astype(jnp.float32))
    return {"wih": wih_p, "whh": whh_p, "b": b_p, "wfc": wfc_p, "bfc": bfc_p}


@jax.jit
def sales_lstm_forward(x, packed):
    """x: (B, T, I) float32, batch_first like the PyTorch module. packed: pack_params(...)."""
    B, T, I = x.shape
    O = OUTPUT_SIZE
    BP = _round_up(max(B, 1), SUBLANE)    # batch padded to full f32 sublanes
    HP, G = packed["whh"].shape
    OP = packed["wfc"].shape[1]

    # Time-major input, batch padded with zero rows (sliced off after the kernel).
    x_tm = jnp.transpose(x, (1, 0, 2)).astype(jnp.float32)          # (T, B, I)
    x_tm = jnp.pad(x_tm, ((0, 0), (0, BP - B), (0, 0)))             # (T, BP, I)

    # Gridless: the whole problem (a few KiB) is VMEM-resident and latency-bound.
    # TODO(synk): for large production batches, add a batch grid axis (tiles of ~256-512
    # rows) with dimension_semantics=("parallel",) so v7x's two TensorCores split the
    # batch; the 128-lane gate layout keeps the per-tile VMEM footprint small.
    vmem = pl.BlockSpec(memory_space=pltpu.MemorySpace.VMEM)
    out_p = pl.pallas_call(
        _lstm_fc_kernel,
        out_shape=jax.ShapeDtypeStruct((BP, OP), jnp.float32),
        in_specs=[vmem] * 6,
        out_specs=vmem,
    )(x_tm, packed["wih"], packed["whh"], packed["b"], packed["wfc"], packed["bfc"])

    return out_p[:B, :O]


def init_params(key):
    H, I, O = HIDDEN_SIZE, INPUT_SIZE, OUTPUT_SIZE
    k = jax.random.split(key, 6)
    s = 1.0 / np.sqrt(H)  # PyTorch default uniform(-1/sqrt(H), 1/sqrt(H))
    return {
        "w_ih": jax.random.uniform(k[0], (4 * H, I), jnp.float32, -s, s),
        "w_hh": jax.random.uniform(k[1], (4 * H, H), jnp.float32, -s, s),
        "b_ih": jax.random.uniform(k[2], (4 * H,), jnp.float32, -s, s),
        "b_hh": jax.random.uniform(k[3], (4 * H,), jnp.float32, -s, s),
        "w_fc": jax.random.uniform(k[4], (O, H), jnp.float32, -s, s),
        "b_fc": jax.random.uniform(k[5], (O,), jnp.float32, -s, s),
    }


def reference_forward(x, params):
    """Pure-JAX reference of the PyTorch module forward."""
    H = HIDDEN_SIZE
    w_ih, w_hh = params["w_ih"], params["w_hh"]
    b = params["b_ih"] + params["b_hh"]
    B, T, _ = x.shape
    h = jnp.zeros((B, H), jnp.float32)
    c = jnp.zeros((B, H), jnp.float32)

    def step(carry, x_t):
        h, c = carry
        gates = x_t @ w_ih.T + h @ w_hh.T + b           # (B, 4H)
        i = jax.nn.sigmoid(gates[:, 0:H])
        f = jax.nn.sigmoid(gates[:, H:2 * H])
        g = jnp.tanh(gates[:, 2 * H:3 * H])
        o = jax.nn.sigmoid(gates[:, 3 * H:4 * H])
        c = f * c + i * g
        h = o * jnp.tanh(c)
        return (h, c), None

    (h, _), _ = lax.scan(step, (h, c), jnp.transpose(x, (1, 0, 2)))
    return jnp.maximum(h, 0.0) @ params["w_fc"].T + params["b_fc"]


if __name__ == "__main__":
    key = jax.random.PRNGKey(0)
    pkey, xkey = jax.random.split(key)
    params = init_params(pkey)
    packed = pack_params(params)          # one-time weight repacking (not per-call)

    B, T = 2, 8
    x = jax.random.normal(xkey, (B, T, INPUT_SIZE), jnp.float32)

    out = sales_lstm_forward(x, packed)
    out = jax.block_until_ready(out)

    ref = reference_forward(x, params)
    assert out.shape == (B, OUTPUT_SIZE)
    np.testing.assert_allclose(np.asarray(out), np.asarray(ref), rtol=1e-5, atol=1e-5)

    print("KERNEL_OK")
</pallas_src>

<mosaic_0001>
module attributes {stable_mosaic.version = 11 : i64} {
  func.func @_lstm_fc_kernel(%arg0: memref<8x8x1xf32, #tpu.memory_space<vmem>>, %arg1: memref<1x128xf32, #tpu.memory_space<vmem>>, %arg2: memref<16x128xf32, #tpu.memory_space<vmem>>, %arg3: memref<1x128xf32, #tpu.memory_space<vmem>>, %arg4: memref<16x128xf32, #tpu.memory_space<vmem>>, %arg5: memref<1x128xf32, #tpu.memory_space<vmem>>, %arg6: memref<8x128xf32, #tpu.memory_space<vmem>>) attributes {dimension_semantics = [], scalar_prefetch = 0 : i64, scratch_operands = 0 : i64, tpu.core_type = #tpu.core_type<tc>} {
    %c0 = arith.constant 0 : index
    %c0_0 = arith.constant 0 : index
    %0 = vector.load %arg1[%c0, %c0_0] : memref<1x128xf32, #tpu.memory_space<vmem>>, vector<1x128xf32>
    %c0_1 = arith.constant 0 : index
    %c0_2 = arith.constant 0 : index
    %1 = vector.load %arg2[%c0_1, %c0_2] : memref<16x128xf32, #tpu.memory_space<vmem>>, vector<16x128xf32>
    %c0_3 = arith.constant 0 : index
    %c0_4 = arith.constant 0 : index
    %2 = vector.load %arg3[%c0_3, %c0_4] : memref<1x128xf32, #tpu.memory_space<vmem>>, vector<1x128xf32>
    %c0_5 = arith.constant 0 : index
    %c0_6 = arith.constant 0 : index
    %3 = vector.load %arg4[%c0_5, %c0_6] : memref<16x128xf32, #tpu.memory_space<vmem>>, vector<16x128xf32>
    %c0_7 = arith.constant 0 : index
    %c0_8 = arith.constant 0 : index
    %4 = vector.load %arg5[%c0_7, %c0_8] : memref<1x128xf32, #tpu.memory_space<vmem>>, vector<1x128xf32>
    %cst = arith.constant 0.000000e+00 : f32
    %5 = vector.broadcast %cst : f32 to vector<8x16xf32>
    %cst_9 = arith.constant 0.000000e+00 : f32
    %6 = vector.broadcast %cst_9 : f32 to vector<8x16xf32>
    %c0_10 = arith.constant 0 : index
    %c0_11 = arith.constant 0 : index
    %c0_12 = arith.constant 0 : index
    %7 = vector.load %arg0[%c0_10, %c0_11, %c0_12] : memref<8x8x1xf32, #tpu.memory_space<vmem>>, vector<1x8x1xf32>
    %8 = vector.shape_cast %7 : vector<1x8x1xf32> to vector<8x1xf32>
    %9 = vector.broadcast %8 : vector<8x1xf32> to vector<8x128xf32>
    %10 = vector.broadcast %0 : vector<1x128xf32> to vector<8x128xf32>
    %11 = arith.mulf %9, %10 : vector<8x128xf32>
    %12 = vector.broadcast %2 : vector<1x128xf32> to vector<8x128xf32>
    %13 = arith.addf %11, %12 : vector<8x128xf32>
    %cst_13 = arith.constant dense<0.000000e+00> : vector<8x128xf32>
    %14 = tpu.matmul %5, %1, %cst_13 {dimension_numbers = #tpu.dot_dimension_numbers<[1], [0], [0], [1], [0, 0, 1, 1], [], []>} : vector<8x16xf32>, vector<16x128xf32>, vector<8x128xf32> -> vector<8x128xf32>
    %15 = arith.addf %13, %14 : vector<8x128xf32>
    %16 = vector.extract_strided_slice %15 {offsets = [0, 0], sizes = [8, 16], strides = [1, 1]} : vector<8x128xf32> to vector<8x16xf32>
    %cst_14 = arith.constant 5.000000e-01 : f32
    %17 = vector.broadcast %cst_14 : f32 to vector<8x16xf32>
    %18 = arith.mulf %17, %16 : vector<8x16xf32>
    %19 = math.tanh %18 : vector<8x16xf32>
    %cst_15 = arith.constant 5.000000e-01 : f32
    %20 = vector.broadcast %cst_15 : f32 to vector<8x16xf32>
    %21 = arith.mulf %20, %19 : vector<8x16xf32>
    %cst_16 = arith.constant 5.000000e-01 : f32
    %22 = vector.broadcast %cst_16 : f32 to vector<8x16xf32>
    %23 = arith.addf %21, %22 : vector<8x16xf32>
    %24 = vector.extract_strided_slice %15 {offsets = [0, 32], sizes = [8, 16], strides = [1, 1]} : vector<8x128xf32> to vector<8x16xf32>
    %cst_17 = arith.constant 5.000000e-01 : f32
    %25 = vector.broadcast %cst_17 : f32 to vector<8x16xf32>
    %26 = arith.mulf %25, %24 : vector<8x16xf32>
    %27 = math.tanh %26 : vector<8x16xf32>
    %cst_18 = arith.constant 5.000000e-01 : f32
    %28 = vector.broadcast %cst_18 : f32 to vector<8x16xf32>
    %29 = arith.mulf %28, %27 : vector<8x16xf32>
    %cst_19 = arith.constant 5.000000e-01 : f32
    %30 = vector.broadcast %cst_19 : f32 to vector<8x16xf32>
    %31 = arith.addf %29, %30 : vector<8x16xf32>
    %32 = vector.extract_strided_slice %15 {offsets = [0, 64], sizes = [8, 16], strides = [1, 1]} : vector<8x128xf32> to vector<8x16xf32>
    %33 = math.tanh %32 : vector<8x16xf32>
    %34 = vector.extract_strided_slice %15 {offsets = [0, 96], sizes = [8, 16], strides = [1, 1]} : vector<8x128xf32> to vector<8x16xf32>
    %cst_20 = arith.constant 5.000000e-01 : f32
    %35 = vector.broadcast %cst_20 : f32 to vector<8x16xf32>
    %36 = arith.mulf %35, %34 : vector<8x16xf32>
    %37 = math.tanh %36 : vector<8x16xf32>
    %cst_21 = arith.constant 5.000000e-01 : f32
    %38 = vector.broadcast %cst_21 : f32 to vector<8x16xf32>
    %39 = arith.mulf %38, %37 : vector<8x16xf32>
    %cst_22 = arith.constant 5.000000e-01 : f32
    %40 = vector.broadcast %cst_22 : f32 to vector<8x16xf32>
    %41 = arith.addf %39, %40 : vector<8x16xf32>
    %42 = arith.mulf %31, %6 : vector<8x16xf32>
    %43 = arith.mulf %23, %33 : vector<8x16xf32>
    %44 = arith.addf %42, %43 : vector<8x16xf32>
    %45 = math.tanh %44 : vector<8x16xf32>
    %46 = arith.mulf %41, %45 : vector<8x16xf32>
    %c1 = arith.constant 1 : index
    %c0_23 = arith.constant 0 : index
    %c0_24 = arith.constant 0 : index
    %47 = vector.load %arg0[%c1, %c0_23, %c0_24] : memref<8x8x1xf32, #tpu.memory_space<vmem>>, vector<1x8x1xf32>
    %48 = vector.shape_cast %47 : vector<1x8x1xf32> to vector<8x1xf32>
    %49 = vector.broadcast %48 : vector<8x1xf32> to vector<8x128xf32>
    %50 = vector.broadcast %0 : vector<1x128xf32> to vector<8x128xf32>
    %51 = arith.mulf %49, %50 : vector<8x128xf32>
    %52 = vector.broadcast %2 : vector<1x128xf32> to vector<8x128xf32>
    %53 = arith.addf %51, %52 : vector<8x128xf32>
    %cst_25 = arith.constant dense<0.000000e+00> : vector<8x128xf32>
    %54 = tpu.matmul %46, %1, %cst_25 {dimension_numbers = #tpu.dot_dimension_numbers<[1], [0], [0], [1], [0, 0, 1, 1], [], []>} : vector<8x16xf32>, vector<16x128xf32>, vector<8x128xf32> -> vector<8x128xf32>
    %55 = arith.addf %53, %54 : vector<8x128xf32>
    %56 = vector.extract_strided_slice %55 {offsets = [0, 0], sizes = [8, 16], strides = [1, 1]} : vector<8x128xf32> to vector<8x16xf32>
    %cst_26 = arith.constant 5.000000e-01 : f32
    %57 = vector.broadcast %cst_26 : f32 to vector<8x16xf32>
    %58 = arith.mulf %57, %56 : vector<8x16xf32>
    %59 = math.tanh %58 : vector<8x16xf32>
    %cst_27 = arith.constant 5.000000e-01 : f32
    %60 = vector.broadcast %cst_27 : f32 to vector<8x16xf32>
    %61 = arith.mulf %60, %59 : vector<8x16xf32>
    %cst_28 = arith.constant 5.000000e-01 : f32
    %62 = vector.broadcast %cst_28 : f32 to vector<8x16xf32>
    %63 = arith.addf %61, %62 : vector<8x16xf32>
    %64 = vector.extract_strided_slice %55 {offsets = [0, 32], sizes = [8, 16], strides = [1, 1]} : vector<8x128xf32> to vector<8x16xf32>
    %cst_29 = arith.constant 5.000000e-01 : f32
    %65 = vector.broadcast %cst_29 : f32 to vector<8x16xf32>
    %66 = arith.mulf %65, %64 : vector<8x16xf32>
    %67 = math.tanh %66 : vector<8x16xf32>
    %cst_30 = arith.constant 5.000000e-01 : f32
    %68 = vector.broadcast %cst_30 : f32 to vector<8x16xf32>
    %69 = arith.mulf %68, %67 : vector<8x16xf32>
    %cst_31 = arith.constant 5.000000e-01 : f32
    %70 = vector.broadcast %cst_31 : f32 to vector<8x16xf32>
    %71 = arith.addf %69, %70 : vector<8x16xf32>
    %72 = vector.extract_strided_slice %55 {offsets = [0, 64], sizes = [8, 16], strides = [1, 1]} : vector<8x128xf32> to vector<8x16xf32>
    %73 = math.tanh %72 : vector<8x16xf32>
    %74 = vector.extract_strided_slice %55 {offsets = [0, 96], sizes = [8, 16], strides = [1, 1]} : vector<8x128xf32> to vector<8x16xf32>
    %cst_32 = arith.constant 5.000000e-01 : f32
    %75 = vector.broadcast %cst_32 : f32 to vector<8x16xf32>
    %76 = arith.mulf %75, %74 : vector<8x16xf32>
    %77 = math.tanh %76 : vector<8x16xf32>
    %cst_33 = arith.constant 5.000000e-01 : f32
    %78 = vector.broadcast %cst_33 : f32 to vector<8x16xf32>
    %79 = arith.mulf %78, %77 : vector<8x16xf32>
    %cst_34 = arith.constant 5.000000e-01 : f32
    %80 = vector.broadcast %cst_34 : f32 to vector<8x16xf32>
    %81 = arith.addf %79, %80 : vector<8x16xf32>
    %82 = arith.mulf %71, %44 : vector<8x16xf32>
    %83 = arith.mulf %63, %73 : vector<8x16xf32>
    %84 = arith.addf %82, %83 : vector<8x16xf32>
    %85 = math.tanh %84 : vector<8x16xf32>
    %86 = arith.mulf %81, %85 : vector<8x16xf32>
    %c2 = arith.constant 2 : index
    %c0_35 = arith.constant 0 : index
    %c0_36 = arith.constant 0 : index
    %87 = vector.load %arg0[%c2, %c0_35, %c0_36] : memref<8x8x1xf32, #tpu.memory_space<vmem>>, vector<1x8x1xf32>
    %88 = vector.shape_cast %87 : vector<1x8x1xf32> to vector<8x1xf32>
    %89 = vector.broadcast %88 : vector<8x1xf32> to vector<8x128xf32>
    %90 = vector.broadcast %0 : vector<1x128xf32> to vector<8x128xf32>
    %91 = arith.mulf %89, %90 : vector<8x128xf32>
    %92 = vector.broadcast %2 : vector<1x128xf32> to vector<8x128xf32>
    %93 = arith.addf %91, %92 : vector<8x128xf32>
    %cst_37 = arith.constant dense<0.000000e+00> : vector<8x128xf32>
    %94 = tpu.matmul %86, %1, %cst_37 {dimension_numbers = #tpu.dot_dimension_numbers<[1], [0], [0], [1], [0, 0, 1, 1], [], []>} : vector<8x16xf32>, vector<16x128xf32>, vector<8x128xf32> -> vector<8x128xf32>
    %95 = arith.addf %93, %94 : vector<8x128xf32>
    %96 = vector.extract_strided_slice %95 {offsets = [0, 0], sizes = [8, 16], strides = [1, 1]} : vector<8x128xf32> to vector<8x16xf32>
    %cst_38 = arith.constant 5.000000e-01 : f32
    %97 = vector.broadcast %cst_38 : f32 to vector<8x16xf32>
    %98 = arith.mulf %97, %96 : vector<8x16xf32>
    %99 = math.tanh %98 : vector<8x16xf32>
    %cst_39 = arith.constant 5.000000e-01 : f32
    %100 = vector.broadcast %cst_39 : f32 to vector<8x16xf32>
    %101 = arith.mulf %100, %99 : vector<8x16xf32>
    %cst_40 = arith.constant 5.000000e-01 : f32
    %102 = vector.broadcast %cst_40 : f32 to vector<8x16xf32>
    %103 = arith.addf %101, %102 : vector<8x16xf32>
    %104 = vector.extract_strided_slice %95 {offsets = [0, 32], sizes = [8, 16], strides = [1, 1]} : vector<8x128xf32> to vector<8x16xf32>
    %cst_41 = arith.constant 5.000000e-01 : f32
    %105 = vector.broadcast %cst_41 : f32 to vector<8x16xf32>
    %106 = arith.mulf %105, %104 : vector<8x16xf32>
    %107 = math.tanh %106 : vector<8x16xf32>
    %cst_42 = arith.constant 5.000000e-01 : f32
    %108 = vector.broadcast %cst_42 : f32 to vector<8x16xf32>
    %109 = arith.mulf %108, %107 : vector<8x16xf32>
    %cst_43 = arith.constant 5.000000e-01 : f32
    %110 = vector.broadcast %cst_43 : f32 to vector<8x16xf32>
    %111 = arith.addf %109, %110 : vector<8x16xf32>
    %112 = vector.extract_strided_slice %95 {offsets = [0, 64], sizes = [8, 16], strides = [1, 1]} : vector<8x128xf32> to vector<8x16xf32>
    %113 = math.tanh %112 : vector<8x16xf32>
    %114 = vector.extract_strided_slice %95 {offsets = [0, 96], sizes = [8, 16], strides = [1, 1]} : vector<8x128xf32> to vector<8x16xf32>
    %cst_44 = arith.constant 5.000000e-01 : f32
    %115 = vector.broadcast %cst_44 : f32 to vector<8x16xf32>
    %116 = arith.mulf %115, %114 : vector<8x16xf32>
    %117 = math.tanh %116 : vector<8x16xf32>
    %cst_45 = arith.constant 5.000000e-01 : f32
    %118 = vector.broadcast %cst_45 : f32 to vector<8x16xf32>
    %119 = arith.mulf %118, %117 : vector<8x16xf32>
    %cst_46 = arith.constant 5.000000e-01 : f32
    %120 = vector.broadcast %cst_46 : f32 to vector<8x16xf32>
    %121 = arith.addf %119, %120 : vector<8x16xf32>
    %122 = arith.mulf %111, %84 : vector<8x16xf32>
    %123 = arith.mulf %103, %113 : vector<8x16xf32>
    %124 = arith.addf %122, %123 : vector<8x16xf32>
    %125 = math.tanh %124 : vector<8x16xf32>
    %126 = arith.mulf %121, %125 : vector<8x16xf32>
    %c3 = arith.constant 3 : index
    %c0_47 = arith.constant 0 : index
    %c0_48 = arith.constant 0 : index
    %127 = vector.load %arg0[%c3, %c0_47, %c0_48] : memref<8x8x1xf32, #tpu.memory_space<vmem>>, vector<1x8x1xf32>
    %128 = vector.shape_cast %127 : vector<1x8x1xf32> to vector<8x1xf32>
    %129 = vector.broadcast %128 : vector<8x1xf32> to vector<8x128xf32>
    %130 = vector.broadcast %0 : vector<1x128xf32> to vector<8x128xf32>
    %131 = arith.mulf %129, %130 : vector<8x128xf32>
    %132 = vector.broadcast %2 : vector<1x128xf32> to vector<8x128xf32>
    %133 = arith.addf %131, %132 : vector<8x128xf32>
    %cst_49 = arith.constant dense<0.000000e+00> : vector<8x128xf32>
    %134 = tpu.matmul %126, %1, %cst_49 {dimension_numbers = #tpu.dot_dimension_numbers<[1], [0], [0], [1], [0, 0, 1, 1], [], []>} : vector<8x16xf32>, vector<16x128xf32>, vector<8x128xf32> -> vector<8x128xf32>
    %135 = arith.addf %133, %134 : vector<8x128xf32>
    %136 = vector.extract_strided_slice %135 {offsets = [0, 0], sizes = [8, 16], strides = [1, 1]} : vector<8x128xf32> to vector<8x16xf32>
    %cst_50 = arith.constant 5.000000e-01 : f32
    %137 = vector.broadcast %cst_50 : f32 to vector<8x16xf32>
    %138 = arith.mulf %137, %136 : vector<8x16xf32>
    %139 = math.tanh %138 : vector<8x16xf32>
    %cst_51 = arith.constant 5.000000e-01 : f32
    %140 = vector.broadcast %cst_51 : f32 to vector<8x16xf32>
    %141 = arith.mulf %140, %139 : vector<8x16xf32>
    %cst_52 = arith.constant 5.000000e-01 : f32
    %142 = vector.broadcast %cst_52 : f32 to vector<8x16xf32>
    %143 = arith.addf %141, %142 : vector<8x16xf32>
    %144 = vector.extract_strided_slice %135 {offsets = [0, 32], sizes = [8, 16], strides = [1, 1]} : vector<8x128xf32> to vector<8x16xf32>
    %cst_53 = arith.constant 5.000000e-01 : f32
    %145 = vector.broadcast %cst_53 : f32 to vector<8x16xf32>
    %146 = arith.mulf %145, %144 : vector<8x16xf32>
    %147 = math.tanh %146 : vector<8x16xf32>
    %cst_54 = arith.constant 5.000000e-01 : f32
    %148 = vector.broadcast %cst_54 : f32 to vector<8x16xf32>
    %149 = arith.mulf %148, %147 : vector<8x16xf32>
    %cst_55 = arith.constant 5.000000e-01 : f32
    %150 = vector.broadcast %cst_55 : f32 to vector<8x16xf32>
    %151 = arith.addf %149, %150 : vector<8x16xf32>
    %152 = vector.extract_strided_slice %135 {offsets = [0, 64], sizes = [8, 16], strides = [1, 1]} : vector<8x128xf32> to vector<8x16xf32>
    %153 = math.tanh %152 : vector<8x16xf32>
    %154 = vector.extract_strided_slice %135 {offsets = [0, 96], sizes = [8, 16], strides = [1, 1]} : vector<8x128xf32> to vector<8x16xf32>
    %cst_56 = arith.constant 5.000000e-01 : f32
    %155 = vector.broadcast %cst_56 : f32 to vector<8x16xf32>
    %156 = arith.mulf %155, %154 : vector<8x16xf32>
    %157 = math.tanh %156 : vector<8x16xf32>
    %cst_57 = arith.constant 5.000000e-01 : f32
    %158 = vector.broadcast %cst_57 : f32 to vector<8x16xf32>
    %159 = arith.mulf %158, %157 : vector<8x16xf32>
    %cst_58 = arith.constant 5.000000e-01 : f32
    %160 = vector.broadcast %cst_58 : f32 to vector<8x16xf32>
    %161 = arith.addf %159, %160 : vector<8x16xf32>
    %162 = arith.mulf %151, %124 : vector<8x16xf32>
    %163 = arith.mulf %143, %153 : vector<8x16xf32>
    %164 = arith.addf %162, %163 : vector<8x16xf32>
    %165 = math.tanh %164 : vector<8x16xf32>
    %166 = arith.mulf %161, %165 : vector<8x16xf32>
    %c4 = arith.constant 4 : index
    %c0_59 = arith.constant 0 : index
    %c0_60 = arith.constant 0 : index
    %167 = vector.load %arg0[%c4, %c0_59, %c0_60] : memref<8x8x1xf32, #tpu.memory_space<vmem>>, vector<1x8x1xf32>
    %168 = vector.shape_cast %167 : vector<1x8x1xf32> to vector<8x1xf32>
    %169 = vector.broadcast %168 : vector<8x1xf32> to vector<8x128xf32>
    %170 = vector.broadcast %0 : vector<1x128xf32> to vector<8x128xf32>
    %171 = arith.mulf %169, %170 : vector<8x128xf32>
    %172 = vector.broadcast %2 : vector<1x128xf32> to vector<8x128xf32>
    %173 = arith.addf %171, %172 : vector<8x128xf32>
    %cst_61 = arith.constant dense<0.000000e+00> : vector<8x128xf32>
    %174 = tpu.matmul %166, %1, %cst_61 {dimension_numbers = #tpu.dot_dimension_numbers<[1], [0], [0], [1], [0, 0, 1, 1], [], []>} : vector<8x16xf32>, vector<16x128xf32>, vector<8x128xf32> -> vector<8x128xf32>
    %175 = arith.addf %173, %174 : vector<8x128xf32>
    %176 = vector.extract_strided_slice %175 {offsets = [0, 0], sizes = [8, 16], strides = [1, 1]} : vector<8x128xf32> to vector<8x16xf32>
    %cst_62 = arith.constant 5.000000e-01 : f32
    %177 = vector.broadcast %cst_62 : f32 to vector<8x16xf32>
    %178 = arith.mulf %177, %176 : vector<8x16xf32>
    %179 = math.tanh %178 : vector<8x16xf32>
    %cst_63 = arith.constant 5.000000e-01 : f32
    %180 = vector.broadcast %cst_63 : f32 to vector<8x16xf32>
    %181 = arith.mulf %180, %179 : vector<8x16xf32>
    %cst_64 = arith.constant 5.000000e-01 : f32
    %182 = vector.broadcast %cst_64 : f32 to vector<8x16xf32>
    %183 = arith.addf %181, %182 : vector<8x16xf32>
    %184 = vector.extract_strided_slice %175 {offsets = [0, 32], sizes = [8, 16], strides = [1, 1]} : vector<8x128xf32> to vector<8x16xf32>
    %cst_65 = arith.constant 5.000000e-01 : f32
    %185 = vector.broadcast %cst_65 : f32 to vector<8x16xf32>
    %186 = arith.mulf %185, %184 : vector<8x16xf32>
    %187 = math.tanh %186 : vector<8x16xf32>
    %cst_66 = arith.constant 5.000000e-01 : f32
    %188 = vector.broadcast %cst_66 : f32 to vector<8x16xf32>
    %189 = arith.mulf %188, %187 : vector<8x16xf32>
    %cst_67 = arith.constant 5.000000e-01 : f32
    %190 = vector.broadcast %cst_67 : f32 to vector<8x16xf32>
    %191 = arith.addf %189, %190 : vector<8x16xf32>
    %192 = vector.extract_strided_slice %175 {offsets = [0, 64], sizes = [8, 16], strides = [1, 1]} : vector<8x128xf32> to vector<8x16xf32>
    %193 = math.tanh %192 : vector<8x16xf32>
    %194 = vector.extract_strided_slice %175 {offsets = [0, 96], sizes = [8, 16], strides = [1, 1]} : vector<8x128xf32> to vector<8x16xf32>
    %cst_68 = arith.constant 5.000000e-01 : f32
    %195 = vector.broadcast %cst_68 : f32 to vector<8x16xf32>
    %196 = arith.mulf %195, %194 : vector<8x16xf32>
    %197 = math.tanh %196 : vector<8x16xf32>
    %cst_69 = arith.constant 5.000000e-01 : f32
    %198 = vector.broadcast %cst_69 : f32 to vector<8x16xf32>
    %199 = arith.mulf %198, %197 : vector<8x16xf32>
    %cst_70 = arith.constant 5.000000e-01 : f32
    %200 = vector.broadcast %cst_70 : f32 to vector<8x16xf32>
    %201 = arith.addf %199, %200 : vector<8x16xf32>
    %202 = arith.mulf %191, %164 : vector<8x16xf32>
    %203 = arith.mulf %183, %193 : vector<8x16xf32>
    %204 = arith.addf %202, %203 : vector<8x16xf32>
    %205 = math.tanh %204 : vector<8x16xf32>
    %206 = arith.mulf %201, %205 : vector<8x16xf32>
    %c5 = arith.constant 5 : index
    %c0_71 = arith.constant 0 : index
    %c0_72 = arith.constant 0 : index
    %207 = vector.load %arg0[%c5, %c0_71, %c0_72] : memref<8x8x1xf32, #tpu.memory_space<vmem>>, vector<1x8x1xf32>
    %208 = vector.shape_cast %207 : vector<1x8x1xf32> to vector<8x1xf32>
    %209 = vector.broadcast %208 : vector<8x1xf32> to vector<8x128xf32>
    %210 = vector.broadcast %0 : vector<1x128xf32> to vector<8x128xf32>
    %211 = arith.mulf %209, %210 : vector<8x128xf32>
    %212 = vector.broadcast %2 : vector<1x128xf32> to vector<8x128xf32>
    %213 = arith.addf %211, %212 : vector<8x128xf32>
    %cst_73 = arith.constant dense<0.000000e+00> : vector<8x128xf32>
    %214 = tpu.matmul %206, %1, %cst_73 {dimension_numbers = #tpu.dot_dimension_numbers<[1], [0], [0], [1], [0, 0, 1, 1], [], []>} : vector<8x16xf32>, vector<16x128xf32>, vector<8x128xf32> -> vector<8x128xf32>
    %215 = arith.addf %213, %214 : vector<8x128xf32>
    %216 = vector.extract_strided_slice %215 {offsets = [0, 0], sizes = [8, 16], strides = [1, 1]} : vector<8x128xf32> to vector<8x16xf32>
    %cst_74 = arith.constant 5.000000e-01 : f32
    %217 = vector.broadcast %cst_74 : f32 to vector<8x16xf32>
    %218 = arith.mulf %217, %216 : vector<8x16xf32>
    %219 = math.tanh %218 : vector<8x16xf32>
    %cst_75 = arith.constant 5.000000e-01 : f32
    %220 = vector.broadcast %cst_75 : f32 to vector<8x16xf32>
    %221 = arith.mulf %220, %219 : vector<8x16xf32>
    %cst_76 = arith.constant 5.000000e-01 : f32
    %222 = vector.broadcast %cst_76 : f32 to vector<8x16xf32>
    %223 = arith.addf %221, %222 : vector<8x16xf32>
    %224 = vector.extract_strided_slice %215 {offsets = [0, 32], sizes = [8, 16], strides = [1, 1]} : vector<8x128xf32> to vector<8x16xf32>
    %cst_77 = arith.constant 5.000000e-01 : f32
    %225 = vector.broadcast %cst_77 : f32 to vector<8x16xf32>
    %226 = arith.mulf %225, %224 : vector<8x16xf32>
    %227 = math.tanh %226 : vector<8x16xf32>
    %cst_78 = arith.constant 5.000000e-01 : f32
    %228 = vector.broadcast %cst_78 : f32 to vector<8x16xf32>
    %229 = arith.mulf %228, %227 : vector<8x16xf32>
    %cst_79 = arith.constant 5.000000e-01 : f32
    %230 = vector.broadcast %cst_79 : f32 to vector<8x16xf32>
    %231 = arith.addf %229, %230 : vector<8x16xf32>
    %232 = vector.extract_strided_slice %215 {offsets = [0, 64], sizes = [8, 16], strides = [1, 1]} : vector<8x128xf32> to vector<8x16xf32>
    %233 = math.tanh %232 : vector<8x16xf32>
    %234 = vector.extract_strided_slice %215 {offsets = [0, 96], sizes = [8, 16], strides = [1, 1]} : vector<8x128xf32> to vector<8x16xf32>
    %cst_80 = arith.constant 5.000000e-01 : f32
    %235 = vector.broadcast %cst_80 : f32 to vector<8x16xf32>
    %236 = arith.mulf %235, %234 : vector<8x16xf32>
    %237 = math.tanh %236 : vector<8x16xf32>
    %cst_81 = arith.constant 5.000000e-01 : f32
    %238 = vector.broadcast %cst_81 : f32 to vector<8x16xf32>
    %239 = arith.mulf %238, %237 : vector<8x16xf32>
    %cst_82 = arith.constant 5.000000e-01 : f32
    %240 = vector.broadcast %cst_82 : f32 to vector<8x16xf32>
    %241 = arith.addf %239, %240 : vector<8x16xf32>
    %242 = arith.mulf %231, %204 : vector<8x16xf32>
    %243 = arith.mulf %223, %233 : vector<8x16xf32>
    %244 = arith.addf %242, %243 : vector<8x16xf32>
    %245 = math.tanh %244 : vector<8x16xf32>
    %246 = arith.mulf %241, %245 : vector<8x16xf32>
    %c6 = arith.constant 6 : index
    %c0_83 = arith.constant 0 : index
    %c0_84 = arith.constant 0 : index
    %247 = vector.load %arg0[%c6, %c0_83, %c0_84] : memref<8x8x1xf32, #tpu.memory_space<vmem>>, vector<1x8x1xf32>
    %248 = vector.shape_cast %247 : vector<1x8x1xf32> to vector<8x1xf32>
    %249 = vector.broadcast %248 : vector<8x1xf32> to vector<8x128xf32>
    %250 = vector.broadcast %0 : vector<1x128xf32> to vector<8x128xf32>
    %251 = arith.mulf %249, %250 : vector<8x128xf32>
    %252 = vector.broadcast %2 : vector<1x128xf32> to vector<8x128xf32>
    %253 = arith.addf %251, %252 : vector<8x128xf32>
    %cst_85 = arith.constant dense<0.000000e+00> : vector<8x128xf32>
    %254 = tpu.matmul %246, %1, %cst_85 {dimension_numbers = #tpu.dot_dimension_numbers<[1], [0], [0], [1], [0, 0, 1, 1], [], []>} : vector<8x16xf32>, vector<16x128xf32>, vector<8x128xf32> -> vector<8x128xf32>
    %255 = arith.addf %253, %254 : vector<8x128xf32>
    %256 = vector.extract_strided_slice %255 {offsets = [0, 0], sizes = [8, 16], strides = [1, 1]} : vector<8x128xf32> to vector<8x16xf32>
    %cst_86 = arith.constant 5.000000e-01 : f32
    %257 = vector.broadcast %cst_86 : f32 to vector<8x16xf32>
    %258 = arith.mulf %257, %256 : vector<8x16xf32>
    %259 = math.tanh %258 : vector<8x16xf32>
    %cst_87 = arith.constant 5.000000e-01 : f32
    %260 = vector.broadcast %cst_87 : f32 to vector<8x16xf32>
    %261 = arith.mulf %260, %259 : vector<8x16xf32>
    %cst_88 = arith.constant 5.000000e-01 : f32
    %262 = vector.broadcast %cst_88 : f32 to vector<8x16xf32>
    %263 = arith.addf %261, %262 : vector<8x16xf32>
    %264 = vector.extract_strided_slice %255 {offsets = [0, 32], sizes = [8, 16], strides = [1, 1]} : vector<8x128xf32> to vector<8x16xf32>
    %cst_89 = arith.constant 5.000000e-01 : f32
    %265 = vector.broadcast %cst_89 : f32 to vector<8x16xf32>
    %266 = arith.mulf %265, %264 : vector<8x16xf32>
    %267 = math.tanh %266 : vector<8x16xf32>
    %cst_90 = arith.constant 5.000000e-01 : f32
    %268 = vector.broadcast %cst_90 : f32 to vector<8x16xf32>
    %269 = arith.mulf %268, %267 : vector<8x16xf32>
    %cst_91 = arith.constant 5.000000e-01 : f32
    %270 = vector.broadcast %cst_91 : f32 to vector<8x16xf32>
    %271 = arith.addf %269, %270 : vector<8x16xf32>
    %272 = vector.extract_strided_slice %255 {offsets = [0, 64], sizes = [8, 16], strides = [1, 1]} : vector<8x128xf32> to vector<8x16xf32>
    %273 = math.tanh %272 : vector<8x16xf32>
    %274 = vector.extract_strided_slice %255 {offsets = [0, 96], sizes = [8, 16], strides = [1, 1]} : vector<8x128xf32> to vector<8x16xf32>
    %cst_92 = arith.constant 5.000000e-01 : f32
    %275 = vector.broadcast %cst_92 : f32 to vector<8x16xf32>
    %276 = arith.mulf %275, %274 : vector<8x16xf32>
    %277 = math.tanh %276 : vector<8x16xf32>
    %cst_93 = arith.constant 5.000000e-01 : f32
    %278 = vector.broadcast %cst_93 : f32 to vector<8x16xf32>
    %279 = arith.mulf %278, %277 : vector<8x16xf32>
    %cst_94 = arith.constant 5.000000e-01 : f32
    %280 = vector.broadcast %cst_94 : f32 to vector<8x16xf32>
    %281 = arith.addf %279, %280 : vector<8x16xf32>
    %282 = arith.mulf %271, %244 : vector<8x16xf32>
    %283 = arith.mulf %263, %273 : vector<8x16xf32>
    %284 = arith.addf %282, %283 : vector<8x16xf32>
    %285 = math.tanh %284 : vector<8x16xf32>
    %286 = arith.mulf %281, %285 : vector<8x16xf32>
    %c7 = arith.constant 7 : index
    %c0_95 = arith.constant 0 : index
    %c0_96 = arith.constant 0 : index
    %287 = vector.load %arg0[%c7, %c0_95, %c0_96] : memref<8x8x1xf32, #tpu.memory_space<vmem>>, vector<1x8x1xf32>
    %288 = vector.shape_cast %287 : vector<1x8x1xf32> to vector<8x1xf32>
    %289 = vector.broadcast %288 : vector<8x1xf32> to vector<8x128xf32>
    %290 = vector.broadcast %0 : vector<1x128xf32> to vector<8x128xf32>
    %291 = arith.mulf %289, %290 : vector<8x128xf32>
    %292 = vector.broadcast %2 : vector<1x128xf32> to vector<8x128xf32>
    %293 = arith.addf %291, %292 : vector<8x128xf32>
    %cst_97 = arith.constant dense<0.000000e+00> : vector<8x128xf32>
    %294 = tpu.matmul %286, %1, %cst_97 {dimension_numbers = #tpu.dot_dimension_numbers<[1], [0], [0], [1], [0, 0, 1, 1], [], []>} : vector<8x16xf32>, vector<16x128xf32>, vector<8x128xf32> -> vector<8x128xf32>
    %295 = arith.addf %293, %294 : vector<8x128xf32>
    %296 = vector.extract_strided_slice %295 {offsets = [0, 0], sizes = [8, 16], strides = [1, 1]} : vector<8x128xf32> to vector<8x16xf32>
    %cst_98 = arith.constant 5.000000e-01 : f32
    %297 = vector.broadcast %cst_98 : f32 to vector<8x16xf32>
    %298 = arith.mulf %297, %296 : vector<8x16xf32>
    %299 = math.tanh %298 : vector<8x16xf32>
    %cst_99 = arith.constant 5.000000e-01 : f32
    %300 = vector.broadcast %cst_99 : f32 to vector<8x16xf32>
    %301 = arith.mulf %300, %299 : vector<8x16xf32>
    %cst_100 = arith.constant 5.000000e-01 : f32
    %302 = vector.broadcast %cst_100 : f32 to vector<8x16xf32>
    %303 = arith.addf %301, %302 : vector<8x16xf32>
    %304 = vector.extract_strided_slice %295 {offsets = [0, 32], sizes = [8, 16], strides = [1, 1]} : vector<8x128xf32> to vector<8x16xf32>
    %cst_101 = arith.constant 5.000000e-01 : f32
    %305 = vector.broadcast %cst_101 : f32 to vector<8x16xf32>
    %306 = arith.mulf %305, %304 : vector<8x16xf32>
    %307 = math.tanh %306 : vector<8x16xf32>
    %cst_102 = arith.constant 5.000000e-01 : f32
    %308 = vector.broadcast %cst_102 : f32 to vector<8x16xf32>
    %309 = arith.mulf %308, %307 : vector<8x16xf32>
    %cst_103 = arith.constant 5.000000e-01 : f32
    %310 = vector.broadcast %cst_103 : f32 to vector<8x16xf32>
    %311 = arith.addf %309, %310 : vector<8x16xf32>
    %312 = vector.extract_strided_slice %295 {offsets = [0, 64], sizes = [8, 16], strides = [1, 1]} : vector<8x128xf32> to vector<8x16xf32>
    %313 = math.tanh %312 : vector<8x16xf32>
    %314 = vector.extract_strided_slice %295 {offsets = [0, 96], sizes = [8, 16], strides = [1, 1]} : vector<8x128xf32> to vector<8x16xf32>
    %cst_104 = arith.constant 5.000000e-01 : f32
    %315 = vector.broadcast %cst_104 : f32 to vector<8x16xf32>
    %316 = arith.mulf %315, %314 : vector<8x16xf32>
    %317 = math.tanh %316 : vector<8x16xf32>
    %cst_105 = arith.constant 5.000000e-01 : f32
    %318 = vector.broadcast %cst_105 : f32 to vector<8x16xf32>
    %319 = arith.mulf %318, %317 : vector<8x16xf32>
    %cst_106 = arith.constant 5.000000e-01 : f32
    %320 = vector.broadcast %cst_106 : f32 to vector<8x16xf32>
    %321 = arith.addf %319, %320 : vector<8x16xf32>
    %322 = arith.mulf %311, %284 : vector<8x16xf32>
    %323 = arith.mulf %303, %313 : vector<8x16xf32>
    %324 = arith.addf %322, %323 : vector<8x16xf32>
    %325 = math.tanh %324 : vector<8x16xf32>
    %326 = arith.mulf %321, %325 : vector<8x16xf32>
    %cst_107 = arith.constant 0.000000e+00 : f32
    %327 = vector.broadcast %cst_107 : f32 to vector<8x16xf32>
    %328 = arith.maximumf %326, %327 : vector<8x16xf32>
    %cst_108 = arith.constant dense<0.000000e+00> : vector<8x128xf32>
    %329 = tpu.matmul %328, %3, %cst_108 {dimension_numbers = #tpu.dot_dimension_numbers<[1], [0], [0], [1], [0, 0, 1, 1], [], []>} : vector<8x16xf32>, vector<16x128xf32>, vector<8x128xf32> -> vector<8x128xf32>
    %330 = vector.broadcast %4 : vector<1x128xf32> to vector<8x128xf32>
    %331 = arith.addf %329, %330 : vector<8x128xf32>
    %c0_109 = arith.constant 0 : index
    %c0_110 = arith.constant 0 : index
    %332 = vector.load %arg6[%c0_109, %c0_110] : memref<8x128xf32, #tpu.memory_space<vmem>>, vector<8x128xf32>
    tpu.vector_store %arg6[%c0_109, %c0_110], %331 {strides = array<i32>} : memref<8x128xf32, #tpu.memory_space<vmem>>, vector<8x128xf32>,
    return
  }
}

</mosaic_0001>

<bundles_post_ra>
// kernel: sales_lstm_forward.1
= control target key start
LH: loop header
LB: loop body
LE: loop exit
PB: predicated region body
PF: predicated region fallthrough
CT: control target
= control target key end

     0   :  { %v1146_v0 = vmov 0.0   ;;  %vm1147_vm0 = vmmov 0   ;;  %v1148_v4 = vmov 0   ;;  %s1149_s30 = smov 64   ;;  %vm50_vm1 = vcmask 130048   ;;  %s1351_s2 = inlined_call_operand.vmem [shape: f32[16,128], index: 2, kind: input, shape index: {}]   ;;  %s1352_s0 = inlined_call_operand.vmem [shape: f32[8,8,1], index: 0, kind: input, shape index: {}]   ;;  %s1353_s1 = inlined_call_operand.vmem [shape: f32[1,128], index: 1, kind: input, shape index: {}]   ;;  %s1354_s3 = inlined_call_operand.vmem [shape: f32[1,128], index: 3, kind: input, shape index: {}]   ;;  %s1355_s4 = inlined_call_operand.vmem [shape: f32[16,128], index: 4, kind: input, shape index: {}]   ;;  %s1356_s5 = inlined_call_operand.vmem [shape: f32[1,128], index: 5, kind: input, shape index: {}]   ;;  %s1357_s6 = inlined_call_operand.vmem [shape: f32[8,128], index: 6, kind: output, shape index: {}]  }
   0x1   :  { %1028 = vmatprep.subr.mxu0 %v1146_v0  ;;  %v1190_v1 = vld [vmem:[%s1351_s2 + $0x8] sm:$0xff]  ;;  %v1195_v2 = vld [vmem:[%s1351_s2] sm:$0xff]  ;;  %1032 = vmatprep.mubr.msk.f32.mxu0 %vm1147_vm0, %v1146_v0  ;;  %v987_v45 = vld [vmem:[%s1352_s0 + $0x10] sm:$0xff] }
   0x2   :  { %v30_v3 = vld [vmem:[%s1352_s0] sm:$0xff]  ;;  %1029 = vmatpush3.msra.mxu0 %v1190_v1  ;;  %1096 = vset.pattern.permute.xlu0 %v1148_v4  ;;  %v985_v24 = vld [vmem:[%s1352_s0 + $0x8] sm:$0xff] }
   0x3   :  { %1030 = vmatprep.subr.mxu0 %v1146_v0  ;;  %33 = vperm.xlu0 %1096, %v30_v3   ;;  %v1223_v5 = vld [vmem:[%s1353_s1] ss:$0 sm:$0xff]  ;;  %s1150_s1 = smov 32  }
   0x4   :  { %1031 = vmatpush3.msra.mxu0 %v1195_v2  ;;  %1035 = vmatprep.subr.mxu1 %v1146_v0  ;;  %v1229_v8 = vld [vmem:[%s1354_s3] ss:$0 sm:$0xff] }
   0x5   :  { %1033 = vmatmul.mubr.f32.vlgmr.msra.gmra.mxu0 %v1146_v0  ;;  %1036 = vmatpush3.msra.mxu1 %v1190_v1 }
   0x6   :  { %1037 = vmatprep.subr.mxu1 %v1146_v0  ;;  %1039 = vmatprep.mubr.msk.f32.mxu1 %vm1147_vm0, %v1146_v0 }
   0x7   :  { %1038 = vmatpush3.msra.mxu1 %v1195_v2  ;;  %1097 = vset.pattern.permute.xlu1 %v1148_v4 }
   0x8   :  { %1042 = vmatprep.subr.mxu0 %v1146_v0  ;;  %1046 = vmatprep.mubr.msk.f32.mxu0 %vm1147_vm0, %v1146_v0 }
   0x9   :  { %1043 = vmatpush3.msra.mxu0 %v1190_v1  ;;  %1049 = vmatprep.subr.mxu1 %v1146_v0 }
   0xa   :  { %1044 = vmatprep.subr.mxu0 %v1146_v0 }
   0xb   :  { %1045 = vmatpush3.msra.mxu0 %v1195_v2 }
   0xc   :  { %1056 = vmatprep.subr.mxu0 %v1146_v0 }
  0x7e   :  { %v34_v6 = vpop.permute.xlu0 %33 }
  0x7f   :  { %v42_v7 = vmul.f32 %v1223_v5, %v34_v6  ;;  %v989_v6 = vld [vmem:[%s1352_s0 + $0x18] sm:$0xff] }
  0x81   :  { %v49_v9 = vadd.f32 %v1229_v8, %v42_v7 }
  0xc5   :  { %v120_v10 = vpop.f32.mrf.mxu0 }
  0xc6   :  { %v124_v11 = vadd.f32 %v120_v10, %v49_v9 }
  0xc7   :  { %v1034_v12 = vpop.f32.mrf.mxu0 }
  0xc8   :  { %1098 = vtanh.f32 %v124_v11  ;;  %v125_v14 = vmul.f32 0.5, %v124_v11 }
  0xca   :  { %1100 = vtanh.f32 %v125_v14 }
  0xd5   :  { %v1099_v13 = vpop.eup %1098 }
  0xd6   :  { %132 = vrot.lane.b32.xlu0 %v1099_v13, %s1149_s30 }
  0xd7   :  { %v1101_v15 = vpop.eup %1100 }
  0xd8   :  { %v127_v16 = vmul.f32 0.5, %v1101_v15 }
  0xda   :  { %v128_v17 = vadd.f32 0.5, %v127_v16 }
  0xdc   :  { %v130_v20 = vmul.f32 0.0, %v128_v17 }
 0x148   :  { %v133_v18 = vpop.permute.xlu0 %132 }
 0x149   :  { %v135_v19 = vmul.f32 %v133_v18, %v128_v17 }
 0x14b   :  { %137 = vrot.lane.b32.xlu1 %v135_v19, %s1150_s1 }
 0x1bd   :  { %v138_v21 = vpop.permute.xlu1 %137 }
 0x1be   :  { %v140_v22 = vadd.f32 %v138_v21, %v130_v20 }
 0x1c0   :  { %1102 = vtanh.f32 %v140_v22 }
 0x1cd   :  { %v1103_v23 = vpop.eup %1102 }
 0x1ce   :  { %143 = vrot.lane.b32.xlu1 %v1103_v23, %s1149_s30 }
 0x1d2   :  { %151 = vperm.xlu1 %1097, %v985_v24  }
 0x240   :  { %v144_v25 = vpop.permute.xlu1 %143 }
 0x241   :  { %v146_v26 = vmul.f32 %v144_v25, %v128_v17 }
 0x243   :  { %157 = vrot.lane.b32.xlu0 %v146_v26, %s1150_s1 }
 0x24d   :  { %v152_v28 = vpop.permute.xlu1 %151 }
 0x24e   :  { %v154_v29 = vmul.f32 %v1223_v5, %v152_v28  ;;  %v991_v28 = vld [vmem:[%s1352_s0 + $0x20] sm:$0xff] }
 0x250   :  { %v155_v30 = vadd.f32 %v1229_v8, %v154_v29 }
 0x2b5   :  { %v158_v27 = vpop.permute.xlu0 %157 }
 0x2b6   :  { %1040 = vmatmul.mubr.msk.f32.vlgmr.msra.gmra.mxu1 %vm50_vm1, %v158_v27 }
 0x2b7   :  { %1050 = vmatpush3.msra.mxu1 %v1190_v1  ;;  %1053 = vmatprep.mubr.msk.f32.mxu1 %vm1147_vm0, %v1146_v0 }
 0x2b8   :  { %1051 = vmatprep.subr.mxu1 %v1146_v0 }
 0x2b9   :  { %1052 = vmatpush3.msra.mxu1 %v1195_v2 }
 0x2ba   :  { %1063 = vmatprep.subr.mxu1 %v1146_v0 }
 0x376   :  { %v227_v31 = vpop.f32.mrf.mxu1 }
 0x377   :  { %v231_v32 = vadd.f32 %v227_v31, %v155_v30 }
 0x378   :  { %v1041_v33 = vpop.f32.mrf.mxu1 }
 0x379   :  { %1104 = vtanh.f32 %v231_v32  ;;  %v232_v35 = vmul.f32 0.5, %v231_v32 }
 0x37b   :  { %1106 = vtanh.f32 %v232_v35 }
 0x386   :  { %v1105_v34 = vpop.eup %1104 }
 0x387   :  { %239 = vrot.lane.b32.xlu0 %v1105_v34, %s1149_s30 }
 0x388   :  { %v1107_v36 = vpop.eup %1106 }
 0x389   :  { %v234_v37 = vmul.f32 0.5, %v1107_v36 }
 0x38b   :  { %v235_v38 = vadd.f32 0.5, %v234_v37 }
 0x38d   :  { %v237_v41 = vmul.f32 %v235_v38, %v140_v22 }
 0x3f9   :  { %v240_v39 = vpop.permute.xlu0 %239 }
 0x3fa   :  { %v242_v40 = vmul.f32 %v240_v39, %v235_v38 }
 0x3fc   :  { %244 = vrot.lane.b32.xlu1 %v242_v40, %s1150_s1 }
 0x46e   :  { %v245_v42 = vpop.permute.xlu1 %244 }
 0x46f   :  { %v247_v43 = vadd.f32 %v245_v42, %v237_v41 }
 0x471   :  { %1108 = vtanh.f32 %v247_v43 }
 0x47e   :  { %v1109_v44 = vpop.eup %1108 }
 0x47f   :  { %250 = vrot.lane.b32.xlu0 %v1109_v44, %s1149_s30 }
 0x483   :  { %258 = vperm.xlu0 %1096, %v987_v45  }
 0x4f1   :  { %v251_v46 = vpop.permute.xlu0 %250 }
 0x4f2   :  { %v253_v47 = vmul.f32 %v251_v46, %v235_v38 }
 0x4f4   :  { %264 = vrot.lane.b32.xlu1 %v253_v47, %s1150_s1 }
 0x4fe   :  { %v259_v49 = vpop.permute.xlu0 %258 }
 0x4ff   :  { %v261_v50 = vmul.f32 %v1223_v5, %v259_v49  ;;  %v993_v49 = vld [vmem:[%s1352_s0 + $0x28] sm:$0xff] }
 0x501   :  { %v262_v51 = vadd.f32 %v1229_v8, %v261_v50 }
 0x566   :  { %v265_v48 = vpop.permute.xlu1 %264 }
 0x567   :  { %1047 = vmatmul.mubr.msk.f32.vlgmr.msra.gmra.mxu0 %vm50_vm1, %v265_v48 }
 0x568   :  { %1057 = vmatpush3.msra.mxu0 %v1190_v1  ;;  %1060 = vmatprep.mubr.msk.f32.mxu0 %vm1147_vm0, %v1146_v0 }
 0x569   :  { %1058 = vmatprep.subr.mxu0 %v1146_v0 }
 0x56a   :  { %1059 = vmatpush3.msra.mxu0 %v1195_v2 }
 0x56b   :  { %1070 = vmatprep.subr.mxu0 %v1146_v0 }
 0x627   :  { %v334_v52 = vpop.f32.mrf.mxu0 }
 0x628   :  { %v338_v53 = vadd.f32 %v334_v52, %v262_v51 }
 0x629   :  { %v1048_v54 = vpop.f32.mrf.mxu0 }
 0x62a   :  { %1110 = vtanh.f32 %v338_v53  ;;  %v339_v56 = vmul.f32 0.5, %v338_v53 }
 0x62c   :  { %1112 = vtanh.f32 %v339_v56 }
 0x637   :  { %v1111_v55 = vpop.eup %1110 }
 0x638   :  { %346 = vrot.lane.b32.xlu1 %v1111_v55, %s1149_s30 }
 0x639   :  { %v1113_v57 = vpop.eup %1112 }
 0x63a   :  { %v341_v58 = vmul.f32 0.5, %v1113_v57 }
 0x63c   :  { %v342_v59 = vadd.f32 0.5, %v341_v58 }
 0x63e   :  { %v344_v62 = vmul.f32 %v342_v59, %v247_v43 }
 0x6aa   :  { %v347_v60 = vpop.permute.xlu1 %346 }
 0x6ab   :  { %v349_v61 = vmul.f32 %v347_v60, %v342_v59 }
 0x6ad   :  { %351 = vrot.lane.b32.xlu0 %v349_v61, %s1150_s1 }
 0x71f   :  { %v352_v63 = vpop.permute.xlu0 %351 }
 0x720   :  { %v354_v3 = vadd.f32 %v352_v63, %v344_v62 }
 0x722   :  { %1114 = vtanh.f32 %v354_v3 }
 0x72f   :  { %v1115_v4 = vpop.eup %1114 }
 0x730   :  { %357 = vrot.lane.b32.xlu1 %v1115_v4, %s1149_s30 }
 0x734   :  { %365 = vperm.xlu1 %1097, %v989_v6  }
 0x7a2   :  { %v358_v7 = vpop.permute.xlu1 %357 }
 0x7a3   :  { %v360_v9 = vmul.f32 %v358_v7, %v342_v59 }
 0x7a5   :  { %371 = vrot.lane.b32.xlu0 %v360_v9, %s1150_s1  ;;  %v995_v9 = vld [vmem:[%s1352_s0 + $0x30] sm:$0xff] }
 0x7af   :  { %v366_v11 = vpop.permute.xlu1 %365 }
 0x7b0   :  { %v368_v12 = vmul.f32 %v1223_v5, %v366_v11 }
 0x7b2   :  { %v369_v13 = vadd.f32 %v1229_v8, %v368_v12 }
 0x817   :  { %v372_v10 = vpop.permute.xlu0 %371 }
 0x818   :  { %1054 = vmatmul.mubr.msk.f32.vlgmr.msra.gmra.mxu1 %vm50_vm1, %v372_v10 }
 0x819   :  { %1064 = vmatpush3.msra.mxu1 %v1190_v1  ;;  %1067 = vmatprep.mubr.msk.f32.mxu1 %vm1147_vm0, %v1146_v0 }
 0x81a   :  { %1065 = vmatprep.subr.mxu1 %v1146_v0 }
 0x81b   :  { %1066 = vmatpush3.msra.mxu1 %v1195_v2 }
 0x81c   :  { %1077 = vmatprep.subr.mxu1 %v1146_v0 }
 0x8d8   :  { %v441_v14 = vpop.f32.mrf.mxu1 }
 0x8d9   :  { %v445_v15 = vadd.f32 %v441_v14, %v369_v13 }
 0x8da   :  { %v1055_v16 = vpop.f32.mrf.mxu1 }
 0x8db   :  { %1116 = vtanh.f32 %v445_v15  ;;  %v446_v18 = vmul.f32 0.5, %v445_v15 }
 0x8dd   :  { %1118 = vtanh.f32 %v446_v18 }
 0x8e8   :  { %v1117_v17 = vpop.eup %1116 }
 0x8e9   :  { %453 = vrot.lane.b32.xlu0 %v1117_v17, %s1149_s30 }
 0x8ea   :  { %v1119_v19 = vpop.eup %1118 }
 0x8eb   :  { %v448_v20 = vmul.f32 0.5, %v1119_v19 }
 0x8ed   :  { %v449_v21 = vadd.f32 0.5, %v448_v20 }
 0x8ef   :  { %v451_v24 = vmul.f32 %v449_v21, %v354_v3 }
 0x95b   :  { %v454_v22 = vpop.permute.xlu0 %453 }
 0x95c   :  { %v456_v23 = vmul.f32 %v454_v22, %v449_v21 }
 0x95e   :  { %458 = vrot.lane.b32.xlu1 %v456_v23, %s1150_s1 }
 0x9d0   :  { %v459_v25 = vpop.permute.xlu1 %458 }
 0x9d1   :  { %v461_v26 = vadd.f32 %v459_v25, %v451_v24 }
 0x9d3   :  { %1120 = vtanh.f32 %v461_v26 }
 0x9e0   :  { %v1121_v27 = vpop.eup %1120 }
 0x9e1   :  { %464 = vrot.lane.b32.xlu0 %v1121_v27, %s1149_s30 }
 0x9e5   :  { %472 = vperm.xlu0 %1096, %v991_v28  }
 0xa53   :  { %v465_v29 = vpop.permute.xlu0 %464 }
 0xa54   :  { %v467_v30 = vmul.f32 %v465_v29, %v449_v21 }
 0xa56   :  { %478 = vrot.lane.b32.xlu1 %v467_v30, %s1150_s1  ;;  %v997_v30 = vld [vmem:[%s1352_s0 + $0x38] sm:$0xff] }
 0xa60   :  { %v473_v32 = vpop.permute.xlu0 %472 }
 0xa61   :  { %v475_v33 = vmul.f32 %v1223_v5, %v473_v32 }
 0xa63   :  { %v476_v34 = vadd.f32 %v1229_v8, %v475_v33 }
 0xac8   :  { %v479_v31 = vpop.permute.xlu1 %478 }
 0xac9   :  { %1061 = vmatmul.mubr.msk.f32.vlgmr.msra.gmra.mxu0 %vm50_vm1, %v479_v31 }
 0xaca   :  { %1071 = vmatpush3.msra.mxu0 %v1190_v1  ;;  %1074 = vmatprep.mubr.msk.f32.mxu0 %vm1147_vm0, %v1146_v0 }
 0xacb   :  { %1072 = vmatprep.subr.mxu0 %v1146_v0 }
 0xacc   :  { %1073 = vmatpush3.msra.mxu0 %v1195_v2 }
 0xacd   :  { %1084 = vmatprep.subr.mxu0 %v1146_v0 }
 0xb89   :  { %v548_v35 = vpop.f32.mrf.mxu0 }
 0xb8a   :  { %v552_v36 = vadd.f32 %v548_v35, %v476_v34 }
 0xb8b   :  { %v1062_v37 = vpop.f32.mrf.mxu0 }
 0xb8c   :  { %1122 = vtanh.f32 %v552_v36  ;;  %v553_v39 = vmul.f32 0.5, %v552_v36 }
 0xb8e   :  { %1124 = vtanh.f32 %v553_v39 }
 0xb99   :  { %v1123_v38 = vpop.eup %1122 }
 0xb9a   :  { %560 = vrot.lane.b32.xlu1 %v1123_v38, %s1149_s30 }
 0xb9b   :  { %v1125_v40 = vpop.eup %1124 }
 0xb9c   :  { %v555_v41 = vmul.f32 0.5, %v1125_v40 }
 0xb9e   :  { %v556_v42 = vadd.f32 0.5, %v555_v41 }
 0xba0   :  { %v558_v45 = vmul.f32 %v556_v42, %v461_v26 }
 0xc0c   :  { %v561_v43 = vpop.permute.xlu1 %560 }
 0xc0d   :  { %v563_v44 = vmul.f32 %v561_v43, %v556_v42 }
 0xc0f   :  { %565 = vrot.lane.b32.xlu0 %v563_v44, %s1150_s1 }
 0xc81   :  { %v566_v46 = vpop.permute.xlu0 %565 }
 0xc82   :  { %v568_v47 = vadd.f32 %v566_v46, %v558_v45 }
 0xc84   :  { %1126 = vtanh.f32 %v568_v47 }
 0xc91   :  { %v1127_v48 = vpop.eup %1126 }
 0xc92   :  { %571 = vrot.lane.b32.xlu1 %v1127_v48, %s1149_s30 }
 0xc96   :  { %579 = vperm.xlu1 %1097, %v993_v49   ;;  %v27_v49 = vld [vmem:[%s1355_s4] sm:$0xff] }
 0xd04   :  { %v572_v50 = vpop.permute.xlu1 %571 }
 0xd05   :  { %v574_v51 = vmul.f32 %v572_v50, %v556_v42 }
 0xd07   :  { %585 = vrot.lane.b32.xlu0 %v574_v51, %s1150_s1 }
 0xd11   :  { %v580_v53 = vpop.permute.xlu1 %579 }
 0xd12   :  { %v582_v54 = vmul.f32 %v1223_v5, %v580_v53 }
 0xd14   :  { %v583_v55 = vadd.f32 %v1229_v8, %v582_v54 }
 0xd79   :  { %v586_v52 = vpop.permute.xlu0 %585 }
 0xd7a   :  { %1068 = vmatmul.mubr.msk.f32.vlgmr.msra.gmra.mxu1 %vm50_vm1, %v586_v52 }
 0xd7b   :  { %1078 = vmatpush3.msra.mxu1 %v1190_v1  ;;  %1081 = vmatprep.mubr.msk.f32.mxu1 %vm1147_vm0, %v1146_v0 }
 0xd7c   :  { %1079 = vmatprep.subr.mxu1 %v1146_v0 }
 0xd7d   :  { %1080 = vmatpush3.msra.mxu1 %v1195_v2 }
 0xe3a   :  { %v655_v56 = vpop.f32.mrf.mxu1 }
 0xe3b   :  { %v659_v57 = vadd.f32 %v655_v56, %v583_v55  ;;  %v999_v55 = vld [vmem:[%s1356_s5] ss:$0 sm:$0xff] }
 0xe3c   :  { %v1069_v58 = vpop.f32.mrf.mxu1 }
 0xe3d   :  { %1128 = vtanh.f32 %v659_v57  ;;  %v660_v1 = vmul.f32 0.5, %v659_v57 }
 0xe3f   :  { %1130 = vtanh.f32 %v660_v1 }
 0xe4a   :  { %v1129_v59 = vpop.eup %1128 }
 0xe4b   :  { %667 = vrot.lane.b32.xlu0 %v1129_v59, %s1149_s30 }
 0xe4c   :  { %v1131_v60 = vpop.eup %1130 }
 0xe4d   :  { %v662_v61 = vmul.f32 0.5, %v1131_v60 }
 0xe4f   :  { %v663_v62 = vadd.f32 0.5, %v662_v61 }
 0xe51   :  { %v665_v2 = vmul.f32 %v663_v62, %v568_v47 }
 0xebd   :  { %v668_v63 = vpop.permute.xlu0 %667 }
 0xebe   :  { %v670_v3 = vmul.f32 %v668_v63, %v663_v62 }
 0xec0   :  { %672 = vrot.lane.b32.xlu1 %v670_v3, %s1150_s1 }
 0xf32   :  { %v673_v4 = vpop.permute.xlu1 %672 }
 0xf33   :  { %v675_v6 = vadd.f32 %v673_v4, %v665_v2 }
 0xf35   :  { %1132 = vtanh.f32 %v675_v6 }
 0xf42   :  { %v1133_v7 = vpop.eup %1132 }
 0xf43   :  { %678 = vrot.lane.b32.xlu0 %v1133_v7, %s1149_s30 }
 0xf47   :  { %686 = vperm.xlu0 %1096, %v995_v9  }
 0xfb5   :  { %v679_v10 = vpop.permute.xlu0 %678 }
 0xfb6   :  { %v681_v11 = vmul.f32 %v679_v10, %v663_v62 }
 0xfb8   :  { %692 = vrot.lane.b32.xlu1 %v681_v11, %s1150_s1 }
 0xfc2   :  { %v687_v13 = vpop.permute.xlu0 %686 }
 0xfc3   :  { %v689_v14 = vmul.f32 %v1223_v5, %v687_v13 }
 0xfc5   :  { %v690_v15 = vadd.f32 %v1229_v8, %v689_v14 }
0x102a   :  { %v693_v12 = vpop.permute.xlu1 %692 }
0x102b   :  { %1075 = vmatmul.mubr.msk.f32.vlgmr.msra.gmra.mxu0 %vm50_vm1, %v693_v12 }
0x102c   :  { %1088 = vmatprep.mubr.msk.f32.mxu0 %vm1147_vm0, %v1146_v0 }
0x10eb   :  { %v762_v16 = vpop.f32.mrf.mxu0 }
0x10ec   :  { %v766_v17 = vadd.f32 %v762_v16, %v690_v15 }
0x10ed   :  { %v1076_v18 = vpop.f32.mrf.mxu0 }
0x10ee   :  { %1134 = vtanh.f32 %v766_v17  ;;  %v767_v20 = vmul.f32 0.5, %v766_v17 }
0x10f0   :  { %1136 = vtanh.f32 %v767_v20 }
0x10fb   :  { %v1135_v19 = vpop.eup %1134 }
0x10fc   :  { %774 = vrot.lane.b32.xlu1 %v1135_v19, %s1149_s30 }
0x10fd   :  { %v1137_v21 = vpop.eup %1136 }
0x10fe   :  { %v769_v22 = vmul.f32 0.5, %v1137_v21 }
0x1100   :  { %v770_v23 = vadd.f32 0.5, %v769_v22 }
0x1102   :  { %v772_v26 = vmul.f32 %v770_v23, %v675_v6 }
0x116e   :  { %v775_v24 = vpop.permute.xlu1 %774 }
0x116f   :  { %v777_v25 = vmul.f32 %v775_v24, %v770_v23 }
0x1171   :  { %779 = vrot.lane.b32.xlu0 %v777_v25, %s1150_s1 }
0x11e3   :  { %v780_v27 = vpop.permute.xlu0 %779 }
0x11e4   :  { %v782_v28 = vadd.f32 %v780_v27, %v772_v26 }
0x11e6   :  { %1138 = vtanh.f32 %v782_v28 }
0x11f3   :  { %v1139_v29 = vpop.eup %1138 }
0x11f4   :  { %785 = vrot.lane.b32.xlu1 %v1139_v29, %s1149_s30 }
0x11f8   :  { %793 = vperm.xlu1 %1097, %v997_v30  }
0x1266   :  { %v786_v31 = vpop.permute.xlu1 %785 }
0x1267   :  { %v788_v32 = vmul.f32 %v786_v31, %v770_v23 }
0x1269   :  { %799 = vrot.lane.b32.xlu0 %v788_v32, %s1150_s1 }
0x1273   :  { %v794_v34 = vpop.permute.xlu1 %793 }
0x1274   :  { %v796_v35 = vmul.f32 %v1223_v5, %v794_v34 }
0x1276   :  { %v797_v36 = vadd.f32 %v1229_v8, %v796_v35  ;;  %v28_v8 = vld [vmem:[%s1355_s4 + $0x8] sm:$0xff] }
0x1277   :  { %1085 = vmatpush3.msra.mxu0 %v28_v8 }
0x1278   :  { %1086 = vmatprep.subr.mxu0 %v1146_v0 }
0x1279   :  { %1087 = vmatpush3.msra.mxu0 %v27_v49 }
0x12db   :  { %v800_v33 = vpop.permute.xlu0 %799 }
0x12dc   :  { %1082 = vmatmul.mubr.msk.f32.vlgmr.msra.gmra.mxu1 %vm50_vm1, %v800_v33 }
0x139c   :  { %v869_v37 = vpop.f32.mrf.mxu1 }
0x139d   :  { %v873_v38 = vadd.f32 %v869_v37, %v797_v36 }
0x139e   :  { %v1083_v39 = vpop.f32.mrf.mxu1 }
0x139f   :  { %1140 = vtanh.f32 %v873_v38  ;;  %v874_v41 = vmul.f32 0.5, %v873_v38 }
0x13a1   :  { %1142 = vtanh.f32 %v874_v41 }
0x13ac   :  { %v1141_v40 = vpop.eup %1140 }
0x13ad   :  { %881 = vrot.lane.b32.xlu0 %v1141_v40, %s1149_s30 }
0x13ae   :  { %v1143_v42 = vpop.eup %1142 }
0x13af   :  { %v876_v43 = vmul.f32 0.5, %v1143_v42 }
0x13b1   :  { %v877_v44 = vadd.f32 0.5, %v876_v43 }
0x13b3   :  { %v879_v47 = vmul.f32 %v877_v44, %v782_v28 }
0x141f   :  { %v882_v45 = vpop.permute.xlu0 %881 }
0x1420   :  { %v884_v46 = vmul.f32 %v882_v45, %v877_v44 }
0x1422   :  { %886 = vrot.lane.b32.xlu1 %v884_v46, %s1150_s1 }
0x1494   :  { %v887_v5 = vpop.permute.xlu1 %886 }
0x1495   :  { %v889_v48 = vadd.f32 %v887_v5, %v879_v47 }
0x1497   :  { %1144 = vtanh.f32 %v889_v48 }
0x14a4   :  { %v1145_v50 = vpop.eup %1144 }
0x14a5   :  { %892 = vrot.lane.b32.xlu0 %v1145_v50, %s1149_s30 }
0x1517   :  { %v893_v51 = vpop.permute.xlu0 %892 }
0x1518   :  { %v895_v52 = vmul.f32 %v893_v51, %v877_v44 }
0x151a   :  { %v896_v53 = vmax.f32 %v895_v52, 0.0 }
0x151c   :  { %904 = vrot.lane.b32.xlu1 %v896_v53, %s1150_s1 }
0x158e   :  { %v905_v54 = vpop.permute.xlu1 %904 }
0x158f   :  { %1089 = vmatmul.mubr.msk.f32.vlgmr.msra.gmra.mxu0 %vm50_vm1, %v905_v54 }
0x164f   :  { %v974_v56 = vpop.f32.mrf.mxu0 }
0x1650   :  { %v975_v57 = vadd.f32 %v999_v55, %v974_v56 }
0x1651   :  { %v1090_v58 = vpop.f32.mrf.mxu0 }
0x1652   :  { %978 = vst [vmem:[%s1357_s6] sm:$0xff] %v975_v57 }

</bundles_post_ra>
